<compile_context>
chip_gen: v5e
topology: v5e:2x2
jax: 0.10.0
libtpu: 0.0.40
codegen_flags: <defaults>
</compile_context>

<pallas_src>
import numpy as np
import jax
import jax.numpy as jnp
from jax.experimental import pallas as pl
from jax.experimental.pallas import tpu as pltpu

N_CLASSES = 9
LOSS_WEIGHT = (0.01, 6, 1, 4, 5, 2, 4, 5, 5)


def _device_defaults():
    """(logits block byte budget, vmem_limit_bytes) per TPU generation."""
    try:
        kind = jax.devices()[0].device_kind.lower()
    except Exception:
        kind = ""
    if "v7" in kind:
        # v7x: 64 MiB physical VMEM per TensorCore -> smaller blocks / limit.
        return 6 * 1024 * 1024, 48 * 1024 * 1024
    # v5e / v6e (and older): 128 MiB physical VMEM -> bigger blocks, less per-step overhead.
    return 12 * 1024 * 1024, 96 * 1024 * 1024


def _bf16_compute_ok():
    """bf16 elementwise math only on chips with bf16 VPU/EUP (v6e and newer)."""
    try:
        kind = jax.devices()[0].device_kind.lower()
    except Exception:
        return False
    return not any(g in kind for g in ("v2", "v3", "v4", "v5"))


def _plan(n, c, hw, itemsize, budget):
    """Pick (hw_pad, batch tile, spatial sublane tile) for (N, C, S, 128) blocks."""
    hw_pad = ((hw + 127) // 128) * 128
    s_full = hw_pad // 128
    bytes_per_sample = c * s_full * 128 * itemsize

    # Case A: one sample's full spatial extent fits the budget -> ssub = S (full dim).
    if bytes_per_sample <= budget:
        tb = 1
        for cand in range(1, n + 1):
            if cand * bytes_per_sample > budget:
                break
            if n % cand != 0:
                continue
            if n >= 2 and n // cand < 2:
                continue  # keep >= 2 blocks on the parallel axis (v7x second TC)
            tb = cand
        return hw_pad, tb, s_full

    # Case B: spatial tiling needed.  Pad HW to a multiple of 1024 so S % 8 == 0,
    # then take the largest multiple-of-8 divisor of S whose block fits the budget.
    hw_pad = ((hw + 1023) // 1024) * 1024
    s_full = hw_pad // 128
    row_bytes = c * 128 * itemsize
    max_ssub = max(8, (budget // row_bytes) // 8 * 8)
    ssub = 8
    for cand in range(8, min(s_full, max_ssub) + 1, 8):
        if s_full % cand == 0:
            ssub = cand
    # TODO(synk): if N == 1 a second parallel spatial split could feed v7x's 2nd core.
    return hw_pad, 1, ssub


def _make_kernel(use_valid_mask, compute_dtype):
    def kernel(x_ref, lab_ref, out_ref):
        """One grid step = (tb samples) x (ssub*128 spatial positions).

        x_ref:   (tb, C, ssub, 128) logits (native dtype)
        lab_ref: (tb, ssub, 128)    int8 class labels (-1 = padding when masked)
        out_ref: (1, C, 128)        f32 per-class partial sums, resident across the
                                    spatial grid axis (lane reduce done in wrapper)
        """
        s = pl.program_id(1)

        @pl.when(s == 0)
        def _():
            out_ref[...] = jnp.zeros_like(out_ref)

        x = x_ref[...]
        if x.dtype != compute_dtype:
            x = x.astype(compute_dtype)                    # (tb, C, ssub, 128)
        lab = lab_ref[...].astype(jnp.int32)[:, None, :, :]  # (tb, 1, ssub, 128)

        # Numerically-stable softmax pieces over the class axis (axis 1): with the
        # spatial-minor layout these are plain VALU ops across C vreg slabs.
        m = jnp.max(x, axis=1, keepdims=True)              # (tb, 1, ssub, 128)
        e = jnp.exp(x - m)                                 # (tb, C, ssub, 128)
        z = jnp.sum(e, axis=1, keepdims=True)              # (tb, 1, ssub, 128)

        # 1/Z on the EUP slot, one Newton step to recover ~f32 accuracy.
        zf = z.astype(jnp.float32)
        r = pl.reciprocal(zf, approx=True)
        r = r * (2.0 - zf * r)
        r = r.astype(compute_dtype)

        # (1 - onehot) rebuilt from integer labels: keep classes != label.
        cls = jax.lax.broadcasted_iota(jnp.int32, x.shape, 1)
        keep = cls != lab
        if use_valid_mask:
            keep = jnp.logical_and(keep, lab >= 0)         # drop spatial padding
        zero = jnp.zeros((), dtype=e.dtype)
        masked = jnp.where(keep, e * r, zero)              # softmax * (1 - onehot)

        # Accumulate in f32, keeping the lane axis (cross-lane reduce deferred to wrapper).
        part = masked.astype(jnp.float32)
        part = jnp.sum(part, axis=0)                       # (C, ssub, 128)
        part = jnp.sum(part, axis=1)                       # (C, 128)
        out_ref[...] += part[None]

    return kernel


def miou_loss_from_labels(inputs, labels, loss_weight=LOSS_WEIGHT):
    """inputs: (N, C, H, W) logits (any float dtype); labels: (N, H, W) int class ids."""
    n, c, h, w = inputs.shape
    assert len(loss_weight) == c, "loss_weight length must equal the class count"
    hw = h * w
    itemsize = inputs.dtype.itemsize

    budget, vmem_limit = _device_defaults()
    hw_pad, tb, ssub = _plan(n, c, hw, itemsize, budget)
    pad = hw_pad - hw
    s_total = hw_pad // 128

    x = inputs.reshape(n, c, hw)                           # native dtype; cast in-kernel
    lab = labels.reshape(n, hw).astype(jnp.int32)
    if pad:
        x = jnp.pad(x, ((0, 0), (0, 0), (0, pad)))
        lab = jnp.pad(lab, ((0, 0), (0, pad)), constant_values=-1)
    x = x.reshape(n, c, s_total, 128)
    lab = lab.astype(jnp.int8).reshape(n, s_total, 128)    # int8 stream: 4x less HBM

    nb, ns = n // tb, s_total // ssub

    compute_dtype = (jnp.bfloat16
                     if (inputs.dtype == jnp.bfloat16 and _bf16_compute_ok())
                     else jnp.float32)
    kernel = _make_kernel(use_valid_mask=(pad > 0), compute_dtype=compute_dtype)

    partials = pl.pallas_call(
        kernel,
        out_shape=jax.ShapeDtypeStruct((nb, c, 128), jnp.float32),
        grid_spec=pltpu.PrefetchScalarGridSpec(
            num_scalar_prefetch=0,
            grid=(nb, ns),
            in_specs=[
                pl.BlockSpec((tb, c, ssub, 128), lambda b, s: (b, 0, s, 0)),  # logits
                pl.BlockSpec((tb, ssub, 128), lambda b, s: (b, s, 0)),        # int8 labels
            ],
            out_specs=pl.BlockSpec((1, c, 128), lambda b, s: (b, 0, 0)),      # partials
        ),
        compiler_params=pltpu.CompilerParams(
            dimension_semantics=("parallel", "arbitrary"),  # batch parallel (megacore),
                                                            # spatial axis is the reduction
            vmem_limit_bytes=vmem_limit,
        ),
    )(x, lab)

    # 9 * w / sum(w), computed like the torch code (float64 numpy, then float32).
    lw = np.asarray(loss_weight, dtype=np.float64)
    lw = jnp.asarray(9.0 * lw / lw.sum(), dtype=jnp.float32)        # (C,)

    inter_per_class = jnp.sum(partials, axis=(0, 2))                # (C,)
    return jnp.sum(inter_per_class * lw) / jnp.float32(n * c)       # == (inter * w).mean()


def miou_loss(inputs, target, loss_weight=LOSS_WEIGHT):
    """Drop-in for the PyTorch forward: `target` is the one-hot (N, C, H, W) map.

    Assumes `target` is an exact one-hot encoding (as produced by the original
    training script); the kernel then works from the integer label map so the
    full one-hot tensor never has to be streamed through the kernel.
    """
    labels = jnp.argmax(target, axis=1)
    return miou_loss_from_labels(inputs, labels, loss_weight)


def miou_loss_ref(inputs, target, loss_weight=LOSS_WEIGHT):
    """Pure-JAX reference mirroring the PyTorch forward exactly."""
    n, c = inputs.shape[0], inputs.shape[1]
    w = np.asarray(loss_weight, dtype=np.float64)
    w = jnp.asarray(9.0 * w / w.sum(), dtype=jnp.float32)
    soft = jax.nn.softmax(inputs.astype(jnp.float32), axis=1)
    inter = (soft * (1.0 - target.astype(jnp.float32))).reshape(n, c, -1).sum(-1)
    return (inter * w).mean()


if __name__ == "__main__":
    key = jax.random.PRNGKey(0)
    k1, k2, k3, k4 = jax.random.split(key, 4)

    N, C, H, W = 2, N_CLASSES, 16, 16

    # Logits from the segmentation net, NCHW; integer labels and their one-hot map.
    inputs = jax.random.normal(k1, (N, C, H, W), dtype=jnp.float32)
    labels = jax.random.randint(k2, (N, H, W), 0, C)
    target = jax.nn.one_hot(labels, C, axis=1, dtype=jnp.float32)

    loss_lbl = jax.block_until_ready(miou_loss_from_labels(inputs, labels))
    loss_1h = jax.block_until_ready(miou_loss(inputs, target))
    ref = jax.block_until_ready(miou_loss_ref(inputs, target))
    assert np.allclose(np.asarray(loss_lbl), np.asarray(ref), rtol=1e-5, atol=1e-5), (
        f"mismatch (labels path): pallas={loss_lbl} ref={ref}"
    )
    assert np.allclose(np.asarray(loss_1h), np.asarray(ref), rtol=1e-5, atol=1e-5), (
        f"mismatch (one-hot path): pallas={loss_1h} ref={ref}"
    )

    # Non-128-multiple spatial size -> exercises wrapper padding + in-kernel valid mask.
    H2, W2 = 15, 17
    inputs2 = jax.random.normal(k3, (N, C, H2, W2), dtype=jnp.float32)
    labels2 = jax.random.randint(k4, (N, H2, W2), 0, C)
    target2 = jax.nn.one_hot(labels2, C, axis=1, dtype=jnp.float32)
    loss2 = jax.block_until_ready(miou_loss_from_labels(inputs2, labels2))
    ref2 = jax.block_until_ready(miou_loss_ref(inputs2, target2))
    assert np.allclose(np.asarray(loss2), np.asarray(ref2), rtol=1e-5, atol=1e-5), (
        f"mismatch (padded path): pallas={loss2} ref={ref2}"
    )

    # bf16 logits -> bf16 elementwise chain on v6e/v7x (f32 on older gens); loose tol.
    inputs_bf16 = inputs.astype(jnp.bfloat16)
    loss_bf16 = jax.block_until_ready(miou_loss_from_labels(inputs_bf16, labels))
    ref_bf16 = jax.block_until_ready(miou_loss_ref(inputs_bf16, target))
    assert np.allclose(np.asarray(loss_bf16), np.asarray(ref_bf16), rtol=5e-2, atol=5e-2), (
        f"mismatch (bf16 path): pallas={loss_bf16} ref={ref_bf16}"
    )

    print("KERNEL_OK")
</pallas_src>

<mosaic_0001>
module attributes {stable_mosaic.version = 11 : i64} {
  func.func @kernel(%arg0: i32, %arg1: i32, %arg2: memref<1x9x2x128xf32, #tpu.memory_space<vmem>>, %arg3: memref<1x2x128xi8, #tpu.memory_space<vmem>>, %arg4: memref<1x9x128xf32, #tpu.memory_space<vmem>>) attributes {dimension_semantics = [#tpu.dimension_semantics<parallel>, #tpu.dimension_semantics<arbitrary>], iteration_bounds = array<i64: 2, 1>, scalar_prefetch = 0 : i64, scratch_operands = 0 : i64, tpu.core_type = #tpu.core_type<tc>, window_params = [{transform_indices = @transform_0, window_bounds = array<i64: 1, 9, 2, 128>}, {transform_indices = @transform_1, window_bounds = array<i64: 1, 2, 128>}, {transform_indices = @transform_2, window_bounds = array<i64: 1, 9, 128>}]} {
    %c0_i32 = arith.constant 0 : i32
    %0 = arith.cmpi eq, %arg1, %c0_i32 : i32
    %1 = arith.extui %0 : i1 to i32
    %c0_i32_0 = arith.constant 0 : i32
    %2 = arith.cmpi ne, %1, %c0_i32_0 : i32
    scf.if %2 {
      %cst_18 = arith.constant 0.000000e+00 : f32
      %32 = vector.broadcast %cst_18 : f32 to vector<1x9x128xf32>
      %c0_19 = arith.constant 0 : index
      %c0_20 = arith.constant 0 : index
      %c0_21 = arith.constant 0 : index
      %33 = vector.load %arg4[%c0_19, %c0_20, %c0_21] : memref<1x9x128xf32, #tpu.memory_space<vmem>>, vector<1x9x128xf32>
      tpu.vector_store %arg4[%c0_19, %c0_20, %c0_21], %32 {strides = array<i32>} : memref<1x9x128xf32, #tpu.memory_space<vmem>>, vector<1x9x128xf32>,
    } else {
    }
    %c0 = arith.constant 0 : index
    %c0_1 = arith.constant 0 : index
    %c0_2 = arith.constant 0 : index
    %c0_3 = arith.constant 0 : index
    %3 = vector.load %arg2[%c0, %c0_1, %c0_2, %c0_3] : memref<1x9x2x128xf32, #tpu.memory_space<vmem>>, vector<1x9x2x128xf32>
    %c0_4 = arith.constant 0 : index
    %c0_5 = arith.constant 0 : index
    %c0_6 = arith.constant 0 : index
    %4 = vector.load %arg3[%c0_4, %c0_5, %c0_6] : memref<1x2x128xi8, #tpu.memory_space<vmem>>, vector<1x2x128xi8>
    %5 = arith.extsi %4 : vector<1x2x128xi8> to vector<1x2x128xi32>
    %6 = vector.shape_cast %5 : vector<1x2x128xi32> to vector<1x1x2x128xi32>
    %cst = arith.constant dense<0xFF800000> : vector<1x2x128xf32>
    %7 = vector.multi_reduction <maximumf>, %3, %cst [1] : vector<1x9x2x128xf32> to vector<1x2x128xf32>
    %8 = vector.shape_cast %7 : vector<1x2x128xf32> to vector<1x1x2x128xf32>
    %9 = vector.broadcast %8 : vector<1x1x2x128xf32> to vector<1x9x2x128xf32>
    %10 = arith.subf %3, %9 : vector<1x9x2x128xf32>
    %11 = math.exp %10 : vector<1x9x2x128xf32>
    %cst_7 = arith.constant dense<0.000000e+00> : vector<1x2x128xf32>
    %12 = vector.multi_reduction <add>, %11, %cst_7 [1] : vector<1x9x2x128xf32> to vector<1x2x128xf32>
    %13 = vector.shape_cast %12 : vector<1x2x128xf32> to vector<1x1x2x128xf32>
    %14 = tpu.reciprocal %13 {approx = true} : vector<1x1x2x128xf32> -> vector<1x1x2x128xf32>
    %15 = arith.mulf %13, %14 : vector<1x1x2x128xf32>
    %cst_8 = arith.constant 2.000000e+00 : f32
    %16 = vector.broadcast %cst_8 : f32 to vector<1x1x2x128xf32>
    %17 = arith.subf %16, %15 : vector<1x1x2x128xf32>
    %18 = arith.mulf %14, %17 : vector<1x1x2x128xf32>
    %19 = tpu.iota {dimensions = array<i32: 1>} : vector<1x9x2x128xi32>
    %20 = vector.broadcast %6 : vector<1x1x2x128xi32> to vector<1x9x2x128xi32>
    %21 = arith.cmpi ne, %19, %20 : vector<1x9x2x128xi32>
    %22 = vector.broadcast %18 : vector<1x1x2x128xf32> to vector<1x9x2x128xf32>
    %23 = arith.mulf %11, %22 : vector<1x9x2x128xf32>
    %cst_9 = arith.constant 0.000000e+00 : f32
    %24 = vector.broadcast %cst_9 : f32 to vector<1x9x2x128xf32>
    %25 = arith.select %21, %23, %24 : vector<1x9x2x128xi1>, vector<1x9x2x128xf32>
    %cst_10 = arith.constant dense<0.000000e+00> : vector<9x2x128xf32>
    %26 = vector.multi_reduction <add>, %25, %cst_10 [0] : vector<1x9x2x128xf32> to vector<9x2x128xf32>
    %cst_11 = arith.constant dense<0.000000e+00> : vector<9x128xf32>
    %27 = vector.multi_reduction <add>, %26, %cst_11 [1] : vector<9x2x128xf32> to vector<9x128xf32>
    %c0_12 = arith.constant 0 : index
    %c0_13 = arith.constant 0 : index
    %c0_14 = arith.constant 0 : index
    %28 = vector.load %arg4[%c0_12, %c0_13, %c0_14] : memref<1x9x128xf32, #tpu.memory_space<vmem>>, vector<1x9x128xf32>
    %29 = vector.shape_cast %27 : vector<9x128xf32> to vector<1x9x128xf32>
    %30 = arith.addf %28, %29 : vector<1x9x128xf32>
    %c0_15 = arith.constant 0 : index
    %c0_16 = arith.constant 0 : index
    %c0_17 = arith.constant 0 : index
    %31 = vector.load %arg4[%c0_15, %c0_16, %c0_17] : memref<1x9x128xf32, #tpu.memory_space<vmem>>, vector<1x9x128xf32>
    tpu.vector_store %arg4[%c0_15, %c0_16, %c0_17], %30 {strides = array<i32>} : memref<1x9x128xf32, #tpu.memory_space<vmem>>, vector<1x9x128xf32>,
    return
  }
  func.func @transform_0(%arg0: i32, %arg1: i32) -> (i32, i32, i32, i32) {
    %c0_i32 = arith.constant 0 : i32
    %c0_i32_0 = arith.constant 0 : i32
    %c0_i32_1 = arith.constant 0 : i32
    return %arg0, %c0_i32, %arg1, %c0_i32_0 : i32, i32, i32, i32
  }
  func.func @transform_1(%arg0: i32, %arg1: i32) -> (i32, i32, i32) {
    %c0_i32 = arith.constant 0 : i32
    %c0_i32_0 = arith.constant 0 : i32
    return %arg0, %arg1, %c0_i32 : i32, i32, i32
  }
  func.func @transform_2(%arg0: i32, %arg1: i32) -> (i32, i32, i32) {
    %c0_i32 = arith.constant 0 : i32
    %c0_i32_0 = arith.constant 0 : i32
    %c0_i32_1 = arith.constant 0 : i32
    return %arg0, %c0_i32, %c0_i32_0 : i32, i32, i32
  }
}

</mosaic_0001>

<bundles_post_ra>
// kernel: tpu_custom_call.1
= control target key start
LH: loop header
LB: loop body
LE: loop exit
PB: predicated region body
PF: predicated region fallthrough
CT: control target
= control target key end

     0   :  { %7 = vsyncpa [#allocation3], 0  ;;  %s945_s0 = inlined_call_operand.hbm [shape: f32[2,9,2,128], index: 0, kind: input, shape index: {}]   ;;  %s946_s1 = inlined_call_operand.hbm [shape: s8[2,2,128], index: 1, kind: input, shape index: {}]   ;;  %s947_s2 = inlined_call_operand.vmem [shape: f32[2,9,128], index: 2, kind: output, shape index: {}]  }
   0x1   :  { %9 = vsyncpa [#allocation3 + $0x1], 0 }
   0x2   :  { %10 = vsyncpa [#allocation5], 0 }
   0x3   :  { %12 = vsyncpa [#allocation5 + $0x1], 0  ;;  %s760_s9 = smov 0   ;;  %s762_s10 = smov 0  }
   0x4   :  { %s764_s11 = smov 0   ;;  %s766_s12 = smov 0  }
   0x5   :  { %s768_s13 = smov 0   ;;  %s770_s14 = smov 0  }
   0x6 LB: > { %s529_s15 = sadd.s32 4294967295, %s740_s14   ;;  %s30_s16 = sadd.s32 1, %s736_s13  ;;  %s740_s14 = sphi %s770_s14, %s18_s14   ;;  %s736_s13 = sphi %s768_s13, %s954_s13   ;;  %s732_s12 = sphi %s766_s12, %s953_s12   ;;  %s728_s11 = sphi %s764_s11, %s952_s11   ;;  %s724_s10 = sphi %s762_s10, %s951_s10   ;;  %s720_s9 = sphi %s760_s9, %s950_s9  }
   0x7   : > { %p32_p0 = scmp.ge.s32.totalorder %s30_s16, 2  ;;  %s39_s17 = sadd.s32 1, %s728_s11 }
   0x8   : > { %p46_p1 = scmp.ne.s32.totalorder %s728_s11, %s724_s10  ;;  %p47_p2 = scmp.eq.s32.totalorder %s740_s14, 0 }
   0x9   : > { %s956_s16 = smov (%p32_p0, %s30_s16), 0  ;;  %p52_p4 = scmp.ne.s32.totalorder %s724_s10, %s720_s9 }
   0xa   : > { %p48_p3 = por %p47_p2, %p46_p1  ;;  %s34_s18 = ssub.s32 %s736_s13, %s956_s16 }
   0xb   : > { %p53_p5 = scmp.eq.s32.totalorder %s529_s15, 0  ;;  %p37_p6 = scmp.eq.s32.totalorder %s34_s18, 0 }
   0xc   : > { %p554_p8 = scmp.lt.s32.totalorder %s740_s14, 2  ;;  %s130_s21 = sand.u32 1, %s728_s11  }
   0xd   : > { %p799_p7 = por %p53_p5, %p52_p4  ;;  %s541_s22 = smul.u32 18, %s736_s13 }
   0xe   : > { %s805_s20 = scalar_select %p37_p6, %s728_s11, %s39_s17  }
   0xf   : > { %s540_s23 = smul.u32 18, %s130_s21  ;;  %s140_s26 = scalar_lea.hbm %s945_s0, %s541_s22 }
  0x10   : > { %p812_p9 = pnand %p554_p8, %p48_p3  ;;  %s141_s28 = sshll.u32 %s140_s26, 4  ;;  %s142_s28 = int_to_ptr.hbm [resolvable:$true] %s141_s28 }
  0x11   : > { %s134_s29 = scalar_lea.vmem [#allocation2], %s540_s23  ;;  %s131_s3 = scalar_lea.sflag [#allocation3], %s130_s21 }
  0x12   : > { %s143_s30 = sshll.u32 %s134_s29, 4  ;;  %s742_s4 = smov 32   ;;  %s144_s30 = int_to_ptr.vmem [resolvable:$true] %s143_s30 }
  0x13   : > { %s743_s5 = smov 2   ;;  %p534_p10 = scmp.ge.s32.totalorder %s740_s14, 1 }
  0x14   : > { %550 = dma.hbm_to_vmem [thread:$0]  (!%p812_p9), %s142_s28, 288, %s144_s30, %s131_s3, %s742_s4, %s742_s4, %s743_s5  }
  0x15   : > { %p169_p11 = scmp.lt.s32.totalorder %s740_s14, 3  ;;  %s160_s8 = scalar_lea.hbm %s946_s1, %s736_s13 }
  0x16   : > { %s162_s9 = sshll.u32 %s160_s8, 4  ;;  %s156_s15 = scalar_lea.vmem [#allocation4], %s130_s21  ;;  %s163_s9 = int_to_ptr.hbm [resolvable:$true] %s162_s9 }
  0x17   : > { %p170_p12 = pnand %p534_p10, %p169_p11  ;;  %s164_s17 = sshll.u32 %s156_s15, 4  ;;  %s165_s17 = int_to_ptr.vmem [resolvable:$true] %s164_s17 }
  0x18   : > { %s154_s18 = scalar_lea.sflag [#allocation5], %s130_s21  ;;  %s827_s22 = sand.u32 (!%p170_p12), 1, %s724_s10  }
  0x19   : > { %553 = dma.hbm_to_vmem [thread:$0]  (!%p812_p9), %s163_s9, 16, %s165_s17, %s154_s18  }
  0x1a   : > { %173 = sbr.rel (%p170_p12) target bundleno = 125 (0x7d), region = 28  ;;  %s176_s24 = scalar_lea.sflag (!%p170_p12), [#allocation3], %s827_s22 }
  0x1b   : > { %s542_s23 = smul.u32 (!%p170_p12), 18, %s827_s22 }
  0x1d   : > { %s179_s25 = scalar_lea.vmem (!%p170_p12), [#allocation2], %s542_s23 }
  0x1f   : > { %711 = dma.done.wait (%p799_p7), %s176_s24, 288  }
  0x20   : > { %713 = vsyncadd (%p799_p7), %s176_s24, 4294967008  ;;  %s186_s21 = scalar_lea.sflag [#allocation5], %s827_s22  ;;  %s188_s26 = scalar_lea.vmem [#allocation4], %s827_s22 }
  0x21   : > { %715 = dma.done.wait (%p799_p7), %s186_s21, 16  }
  0x22   : > { %717 = vsyncadd (%p799_p7), %s186_s21, 4294967280  ;;  %p214_p13 = scmp.lt.s32.totalorder %s732_s12, 1  ;;  %v744_v0 = vmov 0.0   ;;  %vm236_vm0 = vcmask 1041408   ;;  %v225_v1 = vld [vmem:[%s179_s25] sm:$0x3] }
  0x23   : > { %v226_v2 = vld [vmem:[%s179_s25 + $0x2] sm:$0x3]  ;;  %v227_v3 = vld [vmem:[%s179_s25 + $0x4] sm:$0x3]  ;;  %v228_v4 = vld [vmem:[%s179_s25 + $0x6] sm:$0x3] }
  0x24   : > { %s958_s12 = smov (!%p214_p13, %s732_s12), 1  ;;  %v229_v5 = vld [vmem:[%s179_s25 + $0x8] sm:$0x3]  ;;  %v230_v6 = vld [vmem:[%s179_s25 + $0xa] sm:$0x3]  ;;  %v237_v10 = vsel %vm236_vm0, %v225_v1, -inf }
  0x25   : > { %s539_s27 = sshll.u32 %s958_s12, 4  ;;  %v231_v7 = vld [vmem:[%s179_s25 + $0xc] sm:$0x3]  ;;  %v232_v8 = vld [vmem:[%s179_s25 + $0xe] sm:$0x3]  ;;  %v238_v11 = vsel %vm236_vm0, %v226_v2, -inf }
  0x26   : > { %s846_s30 = scalar_lea.vmem %s947_s2, %s539_s27  ;;  %v233_v9 = vld [vmem:[%s179_s25 + $0x10] sm:$0x3]  ;;  %v239_v12 = vsel %vm236_vm0, %v227_v3, -inf  ;;  %v240_v13 = vsel %vm236_vm0, %v228_v4, -inf  ;;  %v241_v14 = vsel %vm236_vm0, %v229_v5, -inf  ;;  %v243_v15 = vsel %vm236_vm0, %v230_v6, -inf }
  0x27   : > { %224 = vst [vmem:[%s846_s30 + $0x8] sm:$0x1] %v744_v0  ;;  %v245_v16 = vsel %vm236_vm0, %v231_v7, -inf  ;;  %v242_v17 = vmax.f32 %v237_v10, %v241_v14  ;;  %v244_v18 = vmax.f32 %v238_v11, %v243_v15  ;;  %v247_v20 = vsel %vm236_vm0, %v232_v8, -inf }
  0x28   : > { %v246_v19 = vmax.f32 %v239_v12, %v245_v16  ;;  %v248_v21 = vmax.f32 %v240_v13, %v247_v20  ;;  %v249_v22 = vsel %vm236_vm0, %v233_v9, -inf  ;;  %vm412_vm9 = vcmask 1041409  }
  0x29   : > { %v250_v23 = vmax.f32 %v242_v17, %v249_v22  ;;  %vm414_vm10 = vcmask 1042434   ;;  %vm416_vm12 = vcmask 1043459   ;;  %vm418_vm13 = vcmask 1044484  }
  0x2a   : > { %v252_v24 = vmax.f32 %v246_v19, %v248_v21  ;;  %vm420_vm14 = vcmask 1045509   ;;  %vm422_vm15 = vcmask 1046534  }
  0x2b   : > { %v251_v25 = vmax.f32 %v250_v23, %v244_v18 }
  0x2d   : > { %v253_v26 = vmax.f32 %v251_v25, %v252_v24 }
  0x2f   : > { %v254_v27 = vsub.f32 %v225_v1, %v253_v26  ;;  %v255_v28 = vsub.f32 %v226_v2, %v253_v26  ;;  %v256_v29 = vsub.f32 %v227_v3, %v253_v26  ;;  %v257_v30 = vsub.f32 %v228_v4, %v253_v26 }
  0x30   : > { %v258_v31 = vsub.f32 %v229_v5, %v253_v26  ;;  %v259_v32 = vsub.f32 %v230_v6, %v253_v26  ;;  %v260_v36 = vsub.f32 %v231_v7, %v253_v26  ;;  %v261_v39 = vsub.f32 %v232_v8, %v253_v26  ;;  %v234_v7 = vld [vmem:[%s188_s26] sm:$0x1] }
  0x31   : > { %v263_v33 = vmul.f32 1.442695, %v254_v27  ;;  %v265_v34 = vmul.f32 1.442695, %v255_v28  ;;  %v267_v35 = vmul.f32 1.442695, %v256_v29  ;;  %v262_v41 = vsub.f32 %v233_v9, %v253_v26 }
  0x32   : > { %v269_v37 = vmul.f32 1.442695, %v257_v30  ;;  %v271_v38 = vmul.f32 1.442695, %v258_v31  ;;  %v273_v40 = vmul.f32 1.442695, %v259_v32  ;;  %v872_v9 = vunpack.c.0.s8 %v234_v7 }
  0x33   : > { %606 = vpow2.f32 %v263_v33  ;;  %v275_v42 = vmul.f32 1.442695, %v260_v36  ;;  %v277_v43 = vmul.f32 1.442695, %v261_v39  ;;  %v279_v46 = vmul.f32 1.442695, %v262_v41 }
  0x34   : > { %608 = vpow2.f32 %v265_v34  ;;  %vm302_vm1 = vcmp.ne.s32.totalorder %v872_v9, 0  ;;  %vm303_vm2 = vcmp.ne.s32.totalorder %v872_v9, 1  ;;  %vm304_vm3 = vcmp.ne.s32.totalorder %v872_v9, 2 }
  0x35   : > { %610 = vpow2.f32 %v267_v35  ;;  %vm305_vm4 = vcmp.ne.s32.totalorder %v872_v9, 3  ;;  %vm306_vm5 = vcmp.ne.s32.totalorder %v872_v9, 4  ;;  %vm307_vm6 = vcmp.ne.s32.totalorder %v872_v9, 5 }
  0x36   : > { %612 = vpow2.f32 %v269_v37  ;;  %vm308_vm7 = vcmp.ne.s32.totalorder %v872_v9, 6  ;;  %vm309_vm8 = vcmp.ne.s32.totalorder %v872_v9, 7  ;;  %vm310_vm11 = vcmp.ne.s32.totalorder %v872_v9, 8  ;;  %v402_v9 = vld [vmem:[%s846_s30 + $0x8] sm:$0x1] }
  0x37   : > { %614 = vpow2.f32 %v271_v38 }
  0x38   : > { %616 = vpow2.f32 %v273_v40 }
  0x39   : > { %v607_v44 = vpop.eup %606  ;;  %618 = vpow2.f32 %v275_v42 }
  0x3a   : > { %v609_v45 = vpop.eup %608  ;;  %v281_v47 = vsel %vm236_vm0, %v607_v44, 0.0  ;;  %620 = vpow2.f32 %v277_v43 }
  0x3b   : > { %v611_v48 = vpop.eup %610  ;;  %v282_v49 = vsel %vm236_vm0, %v609_v45, 0.0  ;;  %622 = vpow2.f32 %v279_v46 }
  0x3c   : > { %v613_v50 = vpop.eup %612  ;;  %v283_v51 = vadd.f32 %v282_v49, %v281_v47  ;;  %v284_v52 = vsel %vm236_vm0, %v611_v48, 0.0 }
  0x3d   : > { %v615_v53 = vpop.eup %614  ;;  %v286_v54 = vsel %vm236_vm0, %v613_v50, 0.0 }
  0x3e   : > { %v617_v55 = vpop.eup %616  ;;  %v285_v56 = vadd.f32 %v284_v52, %v283_v51  ;;  %v288_v57 = vsel %vm236_vm0, %v615_v53, 0.0 }
  0x3f   : > { %v619_v58 = vpop.eup %618  ;;  %v290_v60 = vsel %vm236_vm0, %v617_v55, 0.0 }
  0x40   : > { %v287_v59 = vadd.f32 %v286_v54, %v285_v56  ;;  %v621_v61 = vpop.eup %620  ;;  %v292_v63 = vsel %vm236_vm0, %v619_v58, 0.0 }
  0x41   : > { %v865_v0 = vpop.eup %622  ;;  %v294_v2 = vsel %vm236_vm0, %v621_v61, 0.0 }
  0x42   : > { %v289_v62 = vadd.f32 %v288_v57, %v287_v59  ;;  %v296_v4 = vsel %vm236_vm0, %v865_v0, 0.0 }
  0x44   : > { %v291_v1 = vadd.f32 %v290_v60, %v289_v62 }
  0x46   : > { %v293_v3 = vadd.f32 %v292_v63, %v291_v1 }
  0x48   : > { %v295_v5 = vadd.f32 %v294_v2, %v293_v3 }
  0x4a   : > { %v297_v6 = vadd.f32 %v296_v4, %v295_v5 }
  0x4c   : > { %624 = vrcp.f32 %v297_v6 }
  0x52   : > { %v625_v8 = vpop.eup %624 }
  0x53   : > { %v299_v10 = vmul.f32 %v625_v8, %v297_v6 }
  0x55   : > { %v300_v11 = vsub.f32 2.0, %v299_v10 }
  0x57   : > { %v875_v12 = vmul.f32 %v625_v8, %v300_v11 }
  0x59   : > { %v311_v13 = vmul.f32 %v607_v44, %v875_v12  ;;  %v312_v14 = vmul.f32 %v609_v45, %v875_v12  ;;  %v313_v15 = vmul.f32 %v611_v48, %v875_v12  ;;  %v314_v16 = vmul.f32 %v613_v50, %v875_v12 }
  0x5a   : > { %v315_v17 = vmul.f32 %v615_v53, %v875_v12  ;;  %v316_v18 = vmul.f32 %v617_v55, %v875_v12  ;;  %v317_v19 = vmul.f32 %v619_v58, %v875_v12  ;;  %v318_v20 = vmul.f32 %v621_v61, %v875_v12 }
  0x5b   : > { %v320_v21 = vsel %vm302_vm1, %v311_v13, 0.0  ;;  %v321_v22 = vsel %vm303_vm2, %v312_v14, 0.0  ;;  %v322_v23 = vsel %vm304_vm3, %v313_v15, 0.0  ;;  %v323_v24 = vsel %vm305_vm4, %v314_v16, 0.0 }
  0x5c   : > { %v324_v25 = vsel %vm306_vm5, %v315_v17, 0.0  ;;  %v325_v26 = vsel %vm307_vm6, %v316_v18, 0.0  ;;  %v326_v27 = vsel %vm308_vm7, %v317_v19, 0.0  ;;  %v327_v28 = vsel %vm309_vm8, %v318_v20, 0.0 }
  0x5d   : > { %v338_v29 = vsel %vm236_vm0, %v320_v21, 0.0  ;;  %v345_v30 = vsel %vm236_vm0, %v321_v22, 0.0  ;;  %v352_v31 = vsel %vm236_vm0, %v322_v23, 0.0  ;;  %v359_v32 = vsel %vm236_vm0, %v323_v24, 0.0 }
  0x5e   : > { %v339_v33 = vrot.slane %v338_v29, 4  ;;  %v346_v34 = vrot.slane %v345_v30, 4  ;;  %v353_v35 = vrot.slane %v352_v31, 4  ;;  %v360_v36 = vrot.slane %v359_v32, 4 }
  0x5f   : > { %v366_v37 = vsel %vm236_vm0, %v324_v25, 0.0  ;;  %v373_v38 = vsel %vm236_vm0, %v325_v26, 0.0  ;;  %v380_v39 = vsel %vm236_vm0, %v326_v27, 0.0  ;;  %v387_v40 = vsel %vm236_vm0, %v327_v28, 0.0 }
  0x60   : > { %v340_v41 = vadd.f32 %v339_v33, %v338_v29  ;;  %v347_v42 = vadd.f32 %v346_v34, %v345_v30  ;;  %v354_v43 = vadd.f32 %v353_v35, %v352_v31  ;;  %v361_v44 = vadd.f32 %v360_v36, %v359_v32 }
  0x61   : > { %v367_v45 = vrot.slane %v366_v37, 4  ;;  %v374_v46 = vrot.slane %v373_v38, 4  ;;  %v381_v47 = vrot.slane %v380_v39, 4  ;;  %v388_v48 = vrot.slane %v387_v40, 4 }
  0x62   : > { %v341_v49 = vrot.slane %v340_v41, 2  ;;  %v348_v50 = vrot.slane %v347_v42, 2  ;;  %v355_v51 = vrot.slane %v354_v43, 2  ;;  %v362_v52 = vrot.slane %v361_v44, 2 }
  0x63   : > { %v368_v53 = vadd.f32 %v367_v45, %v366_v37  ;;  %v375_v54 = vadd.f32 %v374_v46, %v373_v38  ;;  %v382_v55 = vadd.f32 %v381_v47, %v380_v39  ;;  %v389_v56 = vadd.f32 %v388_v48, %v387_v40 }
  0x64   : > { %v342_v57 = vadd.f32 %v341_v49, %v340_v41  ;;  %v349_v58 = vadd.f32 %v348_v50, %v347_v42  ;;  %v356_v59 = vadd.f32 %v355_v51, %v354_v43  ;;  %v363_v60 = vadd.f32 %v362_v52, %v361_v44 }
  0x65   : > { %v369_v61 = vrot.slane %v368_v53, 2  ;;  %v376_v62 = vrot.slane %v375_v54, 2  ;;  %v383_v63 = vrot.slane %v382_v55, 2  ;;  %v390_v1 = vrot.slane %v389_v56, 2 }
  0x66   : > { %v343_v2 = vrot.slane %v342_v57, 1  ;;  %v350_v3 = vrot.slane %v349_v58, 1  ;;  %v357_v4 = vrot.slane %v356_v59, 1  ;;  %v364_v5 = vrot.slane %v363_v60, 1 }
  0x67   : > { %v370_v6 = vadd.f32 %v369_v61, %v368_v53  ;;  %v377_v7 = vadd.f32 %v376_v62, %v375_v54  ;;  %v384_v8 = vadd.f32 %v383_v63, %v382_v55  ;;  %v391_v10 = vadd.f32 %v390_v1, %v389_v56 }
  0x68   : > { %v344_v11 = vadd.f32 %v343_v2, %v342_v57  ;;  %v351_v13 = vadd.f32 %v350_v3, %v349_v58  ;;  %v358_v14 = vadd.f32 %v357_v4, %v356_v59  ;;  %v365_v15 = vadd.f32 %v364_v5, %v363_v60 }
  0x69   : > { %v371_v16 = vrot.slane %v370_v6, 1  ;;  %v378_v17 = vrot.slane %v377_v7, 1  ;;  %v385_v18 = vrot.slane %v384_v8, 1  ;;  %v392_v19 = vrot.slane %v391_v10, 1 }
  0x6a   : > { %v413_v20 = vsel %vm412_vm9, %v351_v13, %v344_v11  ;;  %v319_v21 = vmul.f32 %v865_v0, %v875_v12  ;;  %vm424_vm1 = vcmask 1047559  }
  0x6b   : > { %v372_v22 = vadd.f32 %v371_v16, %v370_v6  ;;  %v379_v23 = vadd.f32 %v378_v17, %v377_v7  ;;  %v386_v24 = vadd.f32 %v385_v18, %v384_v8  ;;  %v415_v25 = vsel %vm414_vm10, %v358_v14, %v413_v20 }
  0x6c   : > { %v328_v26 = vsel %vm310_vm11, %v319_v21, 0.0  ;;  %v393_v27 = vadd.f32 %v392_v19, %v391_v10  ;;  %v417_v28 = vsel %vm416_vm12, %v365_v15, %v415_v25 }
  0x6d   : > { %v394_v29 = vsel %vm236_vm0, %v328_v26, 0.0  ;;  %v419_v30 = vsel %vm418_vm13, %v372_v22, %v417_v28 }
  0x6e   : > { %v395_v0 = vrot.slane %v394_v29, 4  ;;  %v421_v12 = vsel %vm420_vm14, %v379_v23, %v419_v30 }
  0x6f   : > { %v423_v31 = vsel %vm422_vm15, %v386_v24, %v421_v12 }
  0x70   : > { %v396_v32 = vadd.f32 %v395_v0, %v394_v29  ;;  %v425_v33 = vsel %vm424_vm1, %v393_v27, %v423_v31 }
  0x71   : > { %430 = vst [vmem:[%s846_s30] sm:$0xff] %v425_v33 }
  0x72   : > { %v397_v34 = vrot.slane %v396_v32, 2 }
  0x74   : > { %v398_v35 = vadd.f32 %v397_v34, %v396_v32 }
  0x76   : > { %v399_v36 = vrot.slane %v398_v35, 1 }
  0x78   : > { %v400_v37 = vadd.f32 %v399_v36, %v398_v35 }
  0x7a   : > { %v429_v38 = vadd.f32 %v402_v9, %v400_v37 }
  0x7c   : > { %431 = vst [vmem:[%s846_s30 + $0x8] sm:$0x1] %v429_v38 }
  0x7d PF: > { %s18_s14 = sadd.s32 1, %s740_s14   ;;  %s950_s9 = smov %s724_s10 }
  0x7e   : > { %p15_p0 = scmp.ge.s32.totalorder %s18_s14, 4   ;;  %s951_s10 = smov %s728_s11 }
  0x7f   : > { %s952_s11 = smov %s805_s20  ;;  %s953_s12 = smov %s736_s13 }
  0x80   : > { %s954_s13 = smov %s956_s16  ;;  %17 = sbr.rel (!%p15_p0) target bundleno = 6 (0x6), region = 85 }
  0x85   :  { %453 = vsyncpa [#allocation3], 1 }
  0x86   :  { %455 = vsyncpa [#allocation3 + $0x1], 1 }
  0x87   :  { %456 = vsyncpa [#allocation5], 1 }
  0x88   :  { %458 = vsyncpa [#allocation5 + $0x1], 1 }

</bundles_post_ra>
